<compile_context>
chip_gen: v7x
topology: tpu7x:2x2x1
jax: 0.10.0
libtpu: 0.0.40
codegen_flags: <defaults>
</compile_context>

<pallas_src>
import functools

import jax
import jax.numpy as jnp
from jax.experimental import pallas as pl
from jax.experimental.pallas import tpu as pltpu


def _round_up(a: int, b: int) -> int:
    return (a + b - 1) // b * b


def highway_kernel(x_ref, w_ref, b_ref, o_ref, *, d_pad):
    """One row-tile of the highway forward pass.

    x_ref : (TM, D_pad)        input rows (native dtype)
    w_ref : (D_pad, 2*D_pad)   fused [Wp^T | Wg^T], resident, single-buffered
    b_ref : (1, 2*D_pad)       fused [bp | bg], f32
    o_ref : (TM, D_pad)        output rows
    """
    x = x_ref[...]  # keep native dtype (bf16 feeds MXU at full rate)

    # single fused matmul -> (TM, 2*D_pad), f32 accumulation
    y = jnp.dot(x, w_ref[...], preferred_element_type=jnp.float32)
    y = y + b_ref[...]

    # slice (lane-tile aligned: d_pad is a multiple of 128)
    x_proj = jnp.maximum(y[:, :d_pad], 0.0)          # relu(x @ Wp^T + bp)
    g = jax.nn.sigmoid(y[:, d_pad:])                 # sigmoid(x @ Wg^T + bg)

    x_f32 = x.astype(jnp.float32)
    o_ref[...] = (g * x_proj + (1.0 - g) * x_f32).astype(o_ref.dtype)


@functools.partial(jax.jit, static_argnames=("tile_m",))
def highway_forward(x, w_proj, b_proj, w_gate, b_gate, *, tile_m=512):
    """Highway forward. x: (..., dim). Weights w_*: (dim, dim) in torch
    layout (out, in); biases b_*: (dim,)."""
    orig_shape = x.shape
    dim = orig_shape[-1]
    x2d = x.reshape(-1, dim)
    n = x2d.shape[0]

    compute_dtype = x.dtype
    itemsize = jnp.dtype(compute_dtype).itemsize

    # Lane-dense feature dim: pad to a multiple of 128.
    d_pad = max(_round_up(dim, 128), 128)

    # Row tile: multiple of 8 sublanes, clamped to the (rounded-up) row count.
    tm = min(_round_up(tile_m, 8), _round_up(n, 8))
    n_pad = _round_up(n, tm)

    # Fused, padded, pre-transposed weights: [Wp^T | Wg^T] -> (d_pad, 2*d_pad).
    w_fused = jnp.zeros((d_pad, 2 * d_pad), dtype=compute_dtype)
    w_fused = w_fused.at[:dim, :dim].set(w_proj.T.astype(compute_dtype))
    w_fused = w_fused.at[:dim, d_pad:d_pad + dim].set(w_gate.T.astype(compute_dtype))

    # Fused biases in f32 (added post-accumulation).
    b_fused = jnp.zeros((1, 2 * d_pad), dtype=jnp.float32)
    b_fused = b_fused.at[0, :dim].set(b_proj.astype(jnp.float32))
    b_fused = b_fused.at[0, d_pad:d_pad + dim].set(b_gate.astype(jnp.float32))

    # Row/feature padded input.
    x_pad = jnp.zeros((n_pad, d_pad), dtype=compute_dtype)
    x_pad = x_pad.at[:n, :dim].set(x2d)

    grid = (n_pad // tm,)

    # Explicit VMEM budget: resident fused weight (single buffer) + bias +
    # double-buffered x/out tiles, with generous headroom.
    vmem_need = (
        d_pad * 2 * d_pad * itemsize      # fused weights, Buffered(1)
        + 2 * d_pad * 4                   # fused bias (f32)
        + 2 * tm * d_pad * itemsize       # x tile, double-buffered
        + 2 * tm * d_pad * itemsize       # out tile, double-buffered
    )
    vmem_limit = min(max(2 * vmem_need + (8 << 20), 32 << 20), 100 << 20)

    kernel = functools.partial(highway_kernel, d_pad=d_pad)

    out = pl.pallas_call(
        kernel,
        out_shape=jax.ShapeDtypeStruct((n_pad, d_pad), x.dtype),
        grid_spec=pltpu.PrefetchScalarGridSpec(
            num_scalar_prefetch=0,
            grid=grid,
            in_specs=[
                # streamed input rows (double-buffered by default)
                pl.BlockSpec((tm, d_pad), lambda i: (i, 0)),
                # resident fused weight: constant index -> single buffer
                pl.BlockSpec((d_pad, 2 * d_pad), lambda i: (0, 0),
                             pipeline_mode=pl.Buffered(1)),
                # resident fused bias: constant index -> single buffer
                pl.BlockSpec((1, 2 * d_pad), lambda i: (0, 0),
                             pipeline_mode=pl.Buffered(1)),
            ],
            out_specs=pl.BlockSpec((tm, d_pad), lambda i: (i, 0)),
        ),
        compiler_params=pltpu.CompilerParams(
            dimension_semantics=("parallel",),
            vmem_limit_bytes=vmem_limit,
        ),
    )(x_pad, w_fused, b_fused)

    # strip row/feature padding
    return out[:n, :dim].reshape(orig_shape)


def highway_ref(x, w_proj, b_proj, w_gate, b_gate):
    """Pure-JAX reference matching torch semantics."""
    x_proj = jax.nn.relu(x @ w_proj.T + b_proj)
    x_gate = jax.nn.sigmoid(x @ w_gate.T + b_gate)
    return x_gate * x_proj + (1.0 - x_gate) * x


if __name__ == "__main__":
    dim = 32
    batch, seq = 2, 8  # 16 rows total

    key = jax.random.PRNGKey(0)
    kx, kwp, kbp, kwg, kbg = jax.random.split(key, 5)

    x = jax.random.normal(kx, (batch, seq, dim), dtype=jnp.float32)

    # torch nn.Linear shapes: W (dim, dim) in (out, in) layout, b (dim,)
    bound = 1.0 / (dim ** 0.5)
    w_proj = jax.random.uniform(kwp, (dim, dim), jnp.float32, -bound, bound)
    b_proj = jax.random.uniform(kbp, (dim,), jnp.float32, -bound, bound)
    w_gate = jax.random.uniform(kwg, (dim, dim), jnp.float32, -bound, bound)
    b_gate = jax.random.uniform(kbg, (dim,), jnp.float32, -bound, bound)

    out = highway_forward(x, w_proj, b_proj, w_gate, b_gate)
    out = jax.block_until_ready(out)

    ref = highway_ref(x, w_proj, b_proj, w_gate, b_gate)
    assert out.shape == x.shape
    assert jnp.allclose(out, ref, atol=1e-5, rtol=1e-5), "mismatch vs reference"

    print("KERNEL_OK")
</pallas_src>

<mosaic_0001>
module attributes {stable_mosaic.version = 11 : i64} {
  func.func @highway_kernel(%arg0: i32, %arg1: memref<16x128xf32, #tpu.memory_space<vmem>>, %arg2: memref<128x256xf32, #tpu.memory_space<vmem>>, %arg3: memref<1x256xf32, #tpu.memory_space<vmem>>, %arg4: memref<16x128xf32, #tpu.memory_space<vmem>>) attributes {dimension_semantics = [#tpu.dimension_semantics<parallel>], iteration_bounds = array<i64: 1>, scalar_prefetch = 0 : i64, scratch_operands = 0 : i64, tpu.core_type = #tpu.core_type<tc>, window_params = [{transform_indices = @transform_0, window_bounds = array<i64: 16, 128>}, {pipeline_mode = #tpu.pipeline_mode<synchronous>, transform_indices = @transform_1, window_bounds = array<i64: 128, 256>}, {pipeline_mode = #tpu.pipeline_mode<synchronous>, transform_indices = @transform_2, window_bounds = array<i64: 1, 256>}, {transform_indices = @transform_3, window_bounds = array<i64: 16, 128>}]} {
    %c0 = arith.constant 0 : index
    %c0_0 = arith.constant 0 : index
    %0 = vector.load %arg1[%c0, %c0_0] : memref<16x128xf32, #tpu.memory_space<vmem>>, vector<16x128xf32>
    %c0_1 = arith.constant 0 : index
    %c0_2 = arith.constant 0 : index
    %1 = vector.load %arg2[%c0_1, %c0_2] : memref<128x256xf32, #tpu.memory_space<vmem>>, vector<128x256xf32>
    %cst = arith.constant dense<0.000000e+00> : vector<16x256xf32>
    %2 = tpu.matmul %0, %1, %cst {dimension_numbers = #tpu.dot_dimension_numbers<[1], [0], [0], [1], [0, 0, 1, 1], [], []>} : vector<16x128xf32>, vector<128x256xf32>, vector<16x256xf32> -> vector<16x256xf32>
    %c0_3 = arith.constant 0 : index
    %c0_4 = arith.constant 0 : index
    %3 = vector.load %arg3[%c0_3, %c0_4] : memref<1x256xf32, #tpu.memory_space<vmem>>, vector<1x256xf32>
    %4 = vector.broadcast %3 : vector<1x256xf32> to vector<16x256xf32>
    %5 = arith.addf %2, %4 : vector<16x256xf32>
    %6 = vector.extract_strided_slice %5 {offsets = [0, 0], sizes = [16, 128], strides = [1, 1]} : vector<16x256xf32> to vector<16x128xf32>
    %cst_5 = arith.constant 0.000000e+00 : f32
    %7 = vector.broadcast %cst_5 : f32 to vector<16x128xf32>
    %8 = arith.maximumf %6, %7 : vector<16x128xf32>
    %9 = vector.extract_strided_slice %5 {offsets = [0, 128], sizes = [16, 128], strides = [1, 1]} : vector<16x256xf32> to vector<16x128xf32>
    %10 = arith.negf %9 : vector<16x128xf32>
    %11 = math.exp %10 : vector<16x128xf32>
    %cst_6 = arith.constant 1.000000e+00 : f32
    %12 = vector.broadcast %cst_6 : f32 to vector<16x128xf32>
    %13 = arith.addf %12, %11 : vector<16x128xf32>
    %14 = arith.divf %12, %13 : vector<16x128xf32>
    %15 = arith.mulf %14, %8 : vector<16x128xf32>
    %cst_7 = arith.constant 1.000000e+00 : f32
    %16 = vector.broadcast %cst_7 : f32 to vector<16x128xf32>
    %17 = arith.subf %16, %14 : vector<16x128xf32>
    %18 = arith.mulf %17, %0 : vector<16x128xf32>
    %19 = arith.addf %15, %18 : vector<16x128xf32>
    %c0_8 = arith.constant 0 : index
    %c0_9 = arith.constant 0 : index
    %20 = vector.load %arg4[%c0_8, %c0_9] : memref<16x128xf32, #tpu.memory_space<vmem>>, vector<16x128xf32>
    tpu.vector_store %arg4[%c0_8, %c0_9], %19 {strides = array<i32>} : memref<16x128xf32, #tpu.memory_space<vmem>>, vector<16x128xf32>,
    return
  }
  func.func @transform_0(%arg0: i32) -> (i32, i32) {
    %c0_i32 = arith.constant 0 : i32
    %c0_i32_0 = arith.constant 0 : i32
    return %arg0, %c0_i32 : i32, i32
  }
  func.func @transform_1(%arg0: i32) -> (i32, i32) {
    %c0_i32 = arith.constant 0 : i32
    %c0_i32_0 = arith.constant 0 : i32
    %c0_i32_1 = arith.constant 0 : i32
    return %c0_i32, %c0_i32_0 : i32, i32
  }
  func.func @transform_2(%arg0: i32) -> (i32, i32) {
    %c0_i32 = arith.constant 0 : i32
    %c0_i32_0 = arith.constant 0 : i32
    %c0_i32_1 = arith.constant 0 : i32
    return %c0_i32, %c0_i32_0 : i32, i32
  }
  func.func @transform_3(%arg0: i32) -> (i32, i32) {
    %c0_i32 = arith.constant 0 : i32
    %c0_i32_0 = arith.constant 0 : i32
    return %arg0, %c0_i32 : i32, i32
  }
}

</mosaic_0001>

<bundles_post_ra>
// kernel: highway_forward.1
= control target key start
LH: loop header
LB: loop body
LE: loop exit
PB: predicated region body
PF: predicated region fallthrough
CT: control target
= control target key end

     0   :  { %v224_v3 = vmov 0.0   ;;  %v50_v51 = vlaneseq  ;;  %s356_s1 = inlined_call_operand.vmem [shape: f32[128,256], index: 1, kind: input, shape index: {}]   ;;  %s357_s0 = inlined_call_operand.vmem [shape: f32[16,128], index: 0, kind: input, shape index: {}]   ;;  %s358_s2 = inlined_call_operand.vmem [shape: f32[1,256], index: 2, kind: input, shape index: {}]   ;;  %s359_s3 = inlined_call_operand.vmem [shape: f32[16,128], index: 3, kind: output, shape index: {}]  }
   0x1   :  { %v17_v0 = vld [vmem:[%s356_s1 + $0x8] sm:$0xff]  ;;  %v19_v1 = vld [vmem:[%s356_s1 + $0x18] sm:$0xff]  ;;  %v16_v2 = vld [vmem:[%s356_s1] sm:$0xff]  ;;  %124 = vmatprep.mubr.f32.mxu0 %v224_v3  ;;  %130 = vmatprep.mubr.f32.mxu1 %v224_v3 }
   0x2   :  { %v167_v4 = vpack.c.bf16 %v19_v1, %v17_v0  ;;  %v18_v5 = vld [vmem:[%s356_s1 + $0x10] sm:$0xff]  ;;  %v21_v6 = vld [vmem:[%s356_s1 + $0x28] sm:$0xff]  ;;  %v23_v7 = vld [vmem:[%s356_s1 + $0x38] sm:$0xff]  ;;  %v51_v52 = vshrl.u32 %v50_v51, 7 }
   0x3   :  { %v169_v8 = vpack.c.bf16 %v18_v5, %v16_v2  ;;  %v171_v9 = vpack.c.bf16 %v23_v7, %v21_v6  ;;  %v20_v10 = vld [vmem:[%s356_s1 + $0x20] sm:$0xff]  ;;  %v22_v11 = vld [vmem:[%s356_s1 + $0x30] sm:$0xff]  ;;  %v25_v12 = vld [vmem:[%s356_s1 + $0x48] sm:$0xff] }
   0x4   :  { %168 = vmatprep.subr.bf16.mxu0 %v167_v4  ;;  %199 = vmatprep.subr.bf16.mxu1 %v167_v4  ;;  %v27_v13 = vld [vmem:[%s356_s1 + $0x58] sm:$0xff]  ;;  %v173_v14 = vpack.c.bf16 %v22_v11, %v20_v10  ;;  %v24_v16 = vld [vmem:[%s356_s1 + $0x40] sm:$0xff]  ;;  %v26_v17 = vld [vmem:[%s356_s1 + $0x50] sm:$0xff]  ;;  %v56_v53 = vsub.s32 1, %v51_v52  ;;  %v52_v1 = vsub.s32 0, %v51_v52 }
   0x5   :  { %170 = vmatpush1.bf16.msra.mxu0 %v169_v8  ;;  %207 = vmatpush1.bf16.msra.mxu1 %v169_v8  ;;  %v175_v15 = vpack.c.bf16 %v27_v13, %v25_v12  ;;  %v29_v18 = vld [vmem:[%s356_s1 + $0x68] sm:$0xff]  ;;  %v31_v19 = vld [vmem:[%s356_s1 + $0x78] sm:$0xff]  ;;  %v177_v20 = vpack.c.bf16 %v26_v17, %v24_v16  ;;  %v28_v22 = vld [vmem:[%s356_s1 + $0x60] sm:$0xff] }
   0x6   :  { %172 = vmatprep.subr.bf16.mxu0 %v171_v9  ;;  %200 = vmatprep.subr.bf16.mxu1 %v171_v9  ;;  %v179_v21 = vpack.c.bf16 %v31_v19, %v29_v18  ;;  %v30_v23 = vld [vmem:[%s356_s1 + $0x70] sm:$0xff]  ;;  %v33_v24 = vld [vmem:[%s356_s1 + $0x88] sm:$0xff]  ;;  %v35_v25 = vld [vmem:[%s356_s1 + $0x98] sm:$0xff] }
   0x7   :  { %v181_v26 = vpack.c.bf16 %v30_v23, %v28_v22  ;;  %v183_v27 = vpack.c.bf16 %v35_v25, %v33_v24  ;;  %v32_v28 = vld [vmem:[%s356_s1 + $0x80] sm:$0xff]  ;;  %v34_v29 = vld [vmem:[%s356_s1 + $0x90] sm:$0xff]  ;;  %v37_v30 = vld [vmem:[%s356_s1 + $0xa8] sm:$0xff] }
   0x8   :  { %v39_v31 = vld [vmem:[%s356_s1 + $0xb8] sm:$0xff]  ;;  %v185_v32 = vpack.c.bf16 %v34_v29, %v32_v28  ;;  %v36_v34 = vld [vmem:[%s356_s1 + $0xa0] sm:$0xff]  ;;  %v38_v35 = vld [vmem:[%s356_s1 + $0xb0] sm:$0xff] }
   0x9   :  { %174 = vmatpush1.bf16.msra.mxu0 %v173_v14  ;;  %208 = vmatpush1.bf16.msra.mxu1 %v173_v14  ;;  %v187_v33 = vpack.c.bf16 %v39_v31, %v37_v30  ;;  %v41_v36 = vld [vmem:[%s356_s1 + $0xc8] sm:$0xff]  ;;  %v43_v37 = vld [vmem:[%s356_s1 + $0xd8] sm:$0xff]  ;;  %v189_v38 = vpack.c.bf16 %v38_v35, %v36_v34  ;;  %v40_v40 = vld [vmem:[%s356_s1 + $0xc0] sm:$0xff] }
   0xa   :  { %176 = vmatprep.subr.bf16.mxu0 %v175_v15  ;;  %201 = vmatprep.subr.bf16.mxu1 %v175_v15  ;;  %v191_v39 = vpack.c.bf16 %v43_v37, %v41_v36  ;;  %v42_v41 = vld [vmem:[%s356_s1 + $0xd0] sm:$0xff]  ;;  %v45_v42 = vld [vmem:[%s356_s1 + $0xe8] sm:$0xff]  ;;  %v47_v43 = vld [vmem:[%s356_s1 + $0xf8] sm:$0xff] }
   0xb   :  { %v193_v44 = vpack.c.bf16 %v42_v41, %v40_v40  ;;  %v195_v45 = vpack.c.bf16 %v47_v43, %v45_v42  ;;  %v44_v46 = vld [vmem:[%s356_s1 + $0xe0] sm:$0xff]  ;;  %v46_v47 = vld [vmem:[%s356_s1 + $0xf0] sm:$0xff]  ;;  %v15_v50 = vld [vmem:[%s357_s0 + $0x8] sm:$0xff] }
   0xc   :  { %v197_v48 = vpack.c.bf16 %v46_v47, %v44_v46  ;;  %v14_v49 = vld [vmem:[%s357_s0] sm:$0xff] }
   0xd   :  { %178 = vmatpush1.bf16.msra.mxu0 %v177_v20  ;;  %209 = vmatpush1.bf16.msra.mxu1 %v177_v20  ;;  %v48_v54 = vld [vmem:[%s358_s2] sm:$0x3] }
   0xe   :  { %180 = vmatprep.subr.bf16.mxu0 %v179_v21  ;;  %202 = vmatprep.subr.bf16.mxu1 %v179_v21  ;;  %v57_v55 = vrot.slane %v48_v54, %v56_v53  ;;  %v53_v5 = vrot.slane %v48_v54, %v52_v1 }
  0x11   :  { %182 = vmatpush1.bf16.msra.mxu0 %v181_v26  ;;  %210 = vmatpush1.bf16.msra.mxu1 %v181_v26 }
  0x12   :  { %184 = vmatprep.subr.bf16.mxu0 %v183_v27  ;;  %203 = vmatprep.subr.bf16.mxu1 %v183_v27 }
  0x15   :  { %186 = vmatpush1.bf16.msra.mxu0 %v185_v32  ;;  %211 = vmatpush1.bf16.msra.mxu1 %v185_v32 }
  0x16   :  { %188 = vmatprep.subr.bf16.mxu0 %v187_v33  ;;  %204 = vmatprep.subr.bf16.mxu1 %v187_v33 }
  0x19   :  { %190 = vmatpush1.bf16.msra.mxu0 %v189_v38  ;;  %212 = vmatpush1.bf16.msra.mxu1 %v189_v38 }
  0x1a   :  { %192 = vmatprep.subr.bf16.mxu0 %v191_v39  ;;  %205 = vmatprep.subr.bf16.mxu1 %v191_v39 }
  0x1d   :  { %194 = vmatpush1.bf16.msra.mxu0 %v193_v44  ;;  %213 = vmatpush1.bf16.msra.mxu1 %v193_v44 }
  0x1e   :  { %196 = vmatprep.subr.bf16.mxu0 %v195_v45  ;;  %206 = vmatprep.subr.bf16.mxu1 %v195_v45 }
  0x21   :  { %198 = vmatpush1.bf16.msra.mxu0 %v197_v48  ;;  %214 = vmatpush1.bf16.msra.mxu1 %v197_v48 }
  0x24   :  { %125 = vmatmul.mubr.f32.vlgmr.msra.gmra.mrb[0].mxu0 %v14_v49  ;;  %131 = vmatmul.mubr.f32.vlgmr.msra.gmra.mrb[0].mxu1 %v15_v50 }
  0xf7   :  { %v126_v56 = vpop.f32.mrb[0].mxu0  ;;  %v132_v57 = vpop.f32.mrb[0].mxu1 }
  0xf8   :  { %v128_v58 = vpop.f32.mrb[1].mxu0  ;;  %v134_v59 = vpop.f32.mrb[1].mxu1  ;;  %v127_v6 = vadd.f32 %v126_v56, %v53_v5  ;;  %v133_v7 = vadd.f32 %v132_v57, %v53_v5 }
  0xf9   :  { %v129_v60 = vadd.f32 %v128_v58, %v57_v55  ;;  %v135_v61 = vadd.f32 %v134_v59, %v57_v55 }
  0xfa   :  { %v137_v8 = vmax.f32 %v127_v6, 0.0  ;;  %v138_v10 = vmax.f32 %v133_v7, 0.0 }
  0xfb   :  { %v165_v62 = vmul.f32 -1.442695, %v129_v60  ;;  %v166_v63 = vmul.f32 -1.442695, %v135_v61 }
  0xfd   :  { %216 = vpow2.f32 %v165_v62 }
  0xfe   :  { %218 = vpow2.f32 %v166_v63 }
 0x107   :  { %v217_v0 = vpop.eup %216 }
 0x108   :  { %v219_v2 = vpop.eup %218  ;;  %v145_v3 = vadd.f32 1.0, %v217_v0 }
 0x109   :  { %v146_v4 = vadd.f32 1.0, %v219_v2 }
 0x10a   :  { %220 = vrcp.f32 %v145_v3 }
 0x10b   :  { %222 = vrcp.f32 %v146_v4 }
 0x114   :  { %v221_v9 = vpop.eup %220 }
 0x115   :  { %v223_v11 = vpop.eup %222  ;;  %v151_v12 = vmul.f32 %v221_v9, %v137_v8  ;;  %v153_v13 = vsub.f32 1.0, %v221_v9 }
 0x116   :  { %v152_v14 = vmul.f32 %v223_v11, %v138_v10  ;;  %v154_v15 = vsub.f32 1.0, %v223_v11 }
 0x117   :  { %v155_v16 = vmul.f32 %v153_v13, %v14_v49 }
 0x118   :  { %v156_v17 = vmul.f32 %v154_v15, %v15_v50 }
 0x119   :  { %v157_v18 = vadd.f32 %v155_v16, %v151_v12 }
 0x11a   :  { %v158_v19 = vadd.f32 %v156_v17, %v152_v14 }
 0x11b   :  { %159 = vst [vmem:[%s359_s3] sm:$0xff] %v157_v18 }
 0x11c   :  { %160 = vst [vmem:[%s359_s3 + $0x8] sm:$0xff] %v158_v19 }

</bundles_post_ra>
